<compile_context>
chip_gen: v6e
topology: v6e:2x2x1
jax: 0.10.0
libtpu: 0.0.40
codegen_flags: <defaults>
</compile_context>

<pallas_src>
import functools

import jax
import jax.numpy as jnp
from jax.experimental import pallas as pl
from jax.experimental.pallas import tpu as pltpu

NEG_INF = -1e30        # additive mask for non-edges (finite -> NaN-free softmax)
LEAKY_SLOPE = 0.2      # PyG GATConv default negative_slope
ROW_TILE = 128         # target-node row tile when N is large (multiple of 8)
VMEM_LIMIT_BYTES = 48 * 1024 * 1024


def _elu(x):
    # exp argument clamped at 0 so the unused branch can never overflow to inf
    return jnp.where(x > 0, x, jnp.exp(jnp.minimum(x, 0.0)) - 1.0)


def _log_softmax(x):
    m = jnp.max(x, axis=-1, keepdims=True)
    return x - (jnp.log(jnp.sum(jnp.exp(x - m), axis=-1, keepdims=True)) + m)


def _gat_attn_kernel(adst_ref, asrc_ref, xwm_ref, cmask_ref, bias_ref, o_ref,
                     *, num_heads, activation):
    """Per-head masked softmax + aggregation for one tile of target rows.

    adst_ref  : [T, H]  f32   a_dst . (W x_i) for this tile's target nodes
    asrc_ref  : [H, N]  f32   a_src . (W x_j) for every source node
    xwm_ref   : [H, N, H*D] bf16  per-head lane-masked projected features
    cmask_ref : [H, H*D] f32  one-hot lane mask selecting head h's columns
    bias_ref  : [T, N]  bf16  0 on edges/self-loops, -1e30 elsewhere
    o_ref     : [T, H*D] f32  lane-dense concatenated head outputs
    """
    f32 = jnp.float32
    bias = bias_ref[...]                 # bf16; upcast folds into the add below
    acc = jnp.zeros(o_ref.shape, f32)
    scale = jnp.zeros(o_ref.shape, f32)
    for h in range(num_heads):           # static unroll (H = 8 or 1)
        s = adst_ref[:, h:h + 1] + asrc_ref[h:h + 1, :]           # [T, N]
        s = jnp.maximum(s, LEAKY_SLOPE * s) + bias   # LeakyReLU + edge mask
        m = jnp.max(s, axis=-1, keepdims=True)
        p = jnp.exp(s - m)                            # unnormalized, <= 1
        # normalization deferred: EUP reciprocal of the row-sum, applied after
        # the matmul via the head's lane block of `scale`.
        inv = pl.reciprocal(jnp.sum(p, axis=-1, keepdims=True), approx=True)
        # TODO(synk): attention dropout (p=0.6) is a no-op here (eval mode).
        # masked-wide aggregation: xwm_ref[h] is zero outside head h's lanes,
        # so the accumulate lands directly in head h's block of [T, H*D].
        acc = acc + jnp.dot(p.astype(jnp.bfloat16), xwm_ref[h],
                            preferred_element_type=f32)
        scale = scale + inv * cmask_ref[h:h + 1, :]               # [T, H*D]
    o_ref[...] = activation(acc * scale)


def _gat_attention(alpha_dst, alpha_src_t, xw_masked, cmask, bias, *,
                   num_heads, activation):
    """Row-tiled fused-heads attention + aggregation (+ fused activation)."""
    n = alpha_dst.shape[0]
    hd = xw_masked.shape[2]
    tile = n if n <= ROW_TILE else ROW_TILE
    assert n % tile == 0, "caller pads N to a multiple of ROW_TILE"
    n_steps = n // tile

    kernel = functools.partial(_gat_attn_kernel,
                               num_heads=num_heads, activation=activation)
    cost = pl.CostEstimate(
        flops=int(num_heads * (2 * n * n * hd + 8 * n * n)),
        transcendentals=int(num_heads * n * n),
        bytes_accessed=int(2 * n * n + 2 * num_heads * n * hd
                           + 4 * n * (num_heads + 2 * hd)),
    )
    return pl.pallas_call(
        kernel,
        out_shape=jax.ShapeDtypeStruct((n, hd), jnp.float32),
        grid=(n_steps,),
        in_specs=[
            pl.BlockSpec((tile, num_heads), lambda i: (i, 0)),      # alpha_dst tile
            pl.BlockSpec((num_heads, n), lambda i: (0, 0)),         # alpha_src^T
            pl.BlockSpec((num_heads, n, hd), lambda i: (0, 0, 0)),  # masked bf16 xw
            pl.BlockSpec((num_heads, hd), lambda i: (0, 0)),        # lane mask
            pl.BlockSpec((tile, n), lambda i: (i, 0)),              # bf16 edge bias
        ],
        out_specs=pl.BlockSpec((tile, hd), lambda i: (i, 0)),
        compiler_params=pltpu.CompilerParams(
            dimension_semantics=("parallel",),        # row tiles independent
            vmem_limit_bytes=VMEM_LIMIT_BYTES),
        cost_estimate=cost,
    )(alpha_dst, alpha_src_t, xw_masked, cmask, bias)


def _gat_layer(x, w_all, a_dst, a_src, cmask, bias, *, heads, head_dim,
               activation):
    """One GATConv layer: hoisted one-time glue (bf16 projection, attention
    logits, per-head lane-masked bf16 copies) + the O(N^2) Pallas kernel."""
    n = x.shape[0]
    hd = heads * head_dim
    # projection done ONCE (not per grid step), bf16 on the MXU, f32 accumulate
    xw = jnp.dot(x.astype(jnp.bfloat16), w_all.astype(jnp.bfloat16),
                 preferred_element_type=jnp.float32)              # [N, H*D]
    xw_h = xw.reshape(n, heads, head_dim)
    alpha_dst = jnp.einsum("nhd,hd->nh", xw_h, a_dst)             # [N, H]
    alpha_src_t = jnp.einsum("nhd,hd->hn", xw_h, a_src)           # [H, N]
    # per-head lane-masked bf16 copies (hoisted out of the head/grid loops)
    xw_masked = (xw[None, :, :] * cmask[:, None, :]).astype(jnp.bfloat16)
    return _gat_attention(alpha_dst, alpha_src_t, xw_masked, cmask, bias,
                          num_heads=heads, activation=activation)


def net_forward(params, x, edge_index):
    """Net.forward (eval): dropout(id) -> GATConv(8 heads)+ELU -> dropout(id)
    -> GATConv(1 head, concat=False) -> log_softmax."""
    n = x.shape[0]
    heads, f_in, head_dim = params["W1"].shape
    hd = heads * head_dim
    c = params["W2"].shape[1]

    n_pad = n if n <= ROW_TILE else ((n + ROW_TILE - 1) // ROW_TILE) * ROW_TILE
    src, dst = edge_index[0], edge_index[1]
    idx = jnp.arange(n)
    # dense additive edge mask built directly in bf16 (no f32 N^2 intermediate)
    # TODO(synk): duplicate edges collapse to one adjacency entry (PyG would
    # softmax each duplicate separately); for large sparse graphs an edge-tiled
    # CSR kernel with PrefetchScalarGridSpec should replace this dense mask.
    bias = (jnp.full((n_pad, n_pad), NEG_INF, jnp.bfloat16)
            .at[dst, src].set(0.0)
            .at[idx, idx].set(0.0))                 # add_self_loops=True
    if n_pad != n:
        x = jnp.pad(x, ((0, n_pad - n), (0, 0)))

    cmask1 = jnp.repeat(jnp.eye(heads, dtype=jnp.float32), head_dim, axis=1)
    cmask2 = jnp.ones((1, c), jnp.float32)
    w1_all = jnp.transpose(params["W1"], (1, 0, 2)).reshape(f_in, hd)  # [F, H*D]

    # F.dropout(p=0.6, training=False) is the identity -> omitted (eval mode).
    h = _gat_layer(x, w1_all, params["a_dst1"], params["a_src1"], cmask1, bias,
                   heads=heads, head_dim=head_dim, activation=_elu)
    out = _gat_layer(h, params["W2"],
                     params["a_dst2"].reshape(1, c),
                     params["a_src2"].reshape(1, c), cmask2, bias,
                     heads=1, head_dim=c, activation=_log_softmax)
    return out[:n]


def init_params(key, in_channels, out_channels, heads=8, head_dim=8):
    ks = jax.random.split(key, 6)

    def glorot(k, shape, fan_in, fan_out):
        s = (2.0 / (fan_in + fan_out)) ** 0.5
        return s * jax.random.normal(k, shape, jnp.float32)

    hidden = heads * head_dim  # 8 ** 2 = 64
    return dict(
        W1=glorot(ks[0], (heads, in_channels, head_dim), in_channels, hidden),
        a_src1=glorot(ks[1], (heads, head_dim), head_dim, 1),
        a_dst1=glorot(ks[2], (heads, head_dim), head_dim, 1),
        W2=glorot(ks[3], (hidden, out_channels), hidden, out_channels),
        a_src2=glorot(ks[4], (out_channels,), out_channels, 1),
        a_dst2=glorot(ks[5], (out_channels,), out_channels, 1),
    )


def _reference(params, x, edge_index):
    """Pure-JAX reference of the same forward pass (f32 end-to-end)."""
    n = x.shape[0]
    src, dst = edge_index[0], edge_index[1]
    adj = jnp.zeros((n, n), jnp.float32).at[dst, src].set(1.0)
    adj = adj.at[jnp.arange(n), jnp.arange(n)].set(1.0)

    def head(xin, w, asrc, adst):
        xw = xin @ w
        e = (xw @ adst)[:, None] + (xw @ asrc)[None, :]
        e = jnp.where(e > 0, e, LEAKY_SLOPE * e)
        e = jnp.where(adj > 0, e, NEG_INF)
        a = jax.nn.softmax(e, axis=-1)
        return a @ xw

    h = jnp.concatenate(
        [head(x, params["W1"][k], params["a_src1"][k], params["a_dst1"][k])
         for k in range(params["W1"].shape[0])], axis=-1)
    h = jax.nn.elu(h)
    o = head(h, params["W2"], params["a_src2"], params["a_dst2"])
    return jax.nn.log_softmax(o, axis=-1)


if __name__ == "__main__":
    N, IN_CH, OUT_CH, E = 16, 16, 8, 40
    key = jax.random.PRNGKey(0)
    k_x, k_src, k_dst, k_par = jax.random.split(key, 4)

    x = jax.random.normal(k_x, (N, IN_CH), jnp.float32)
    src = jax.random.randint(k_src, (E,), 0, N)
    dst = jax.random.randint(k_dst, (E,), 0, N)
    edge_index = jnp.stack([src, dst]).astype(jnp.int32)   # [2, E]

    params = init_params(k_par, IN_CH, OUT_CH)

    out = net_forward(params, x, edge_index)               # [N, OUT_CH] log-probs
    jax.block_until_ready(out)
    assert out.shape == (N, OUT_CH)
    assert bool(jnp.all(jnp.isfinite(out)))

    ref = _reference(params, x, edge_index)
    # bf16 projection/aggregation + approx reciprocal -> loose tolerance vs f32
    assert jnp.allclose(out, ref, atol=1e-1, rtol=1e-1), \
        float(jnp.max(jnp.abs(out - ref)))
    print("KERNEL_OK")
</pallas_src>

<mosaic_0001>
module attributes {stable_mosaic.version = 11 : i64} {
  func.func @_gat_attn_kernel(%arg0: i32, %arg1: memref<16x8xf32, #tpu.memory_space<vmem>>, %arg2: memref<8x16xf32, #tpu.memory_space<vmem>>, %arg3: memref<8x16x64xbf16, #tpu.memory_space<vmem>>, %arg4: memref<8x64xf32, #tpu.memory_space<vmem>>, %arg5: memref<16x16xbf16, #tpu.memory_space<vmem>>, %arg6: memref<16x64xf32, #tpu.memory_space<vmem>>) attributes {dimension_semantics = [#tpu.dimension_semantics<parallel>], iteration_bounds = array<i64: 1>, scalar_prefetch = 0 : i64, scratch_operands = 0 : i64, tpu.core_type = #tpu.core_type<tc>, window_params = [{transform_indices = @transform_0, window_bounds = array<i64: 16, 8>}, {pipeline_mode = #tpu.pipeline_mode<synchronous>, transform_indices = @transform_1, window_bounds = array<i64: 8, 16>}, {pipeline_mode = #tpu.pipeline_mode<synchronous>, transform_indices = @transform_2, window_bounds = array<i64: 8, 16, 64>}, {pipeline_mode = #tpu.pipeline_mode<synchronous>, transform_indices = @transform_3, window_bounds = array<i64: 8, 64>}, {transform_indices = @transform_4, window_bounds = array<i64: 16, 16>}, {transform_indices = @transform_5, window_bounds = array<i64: 16, 64>}]} {
    %c0 = arith.constant 0 : index
    %c0_0 = arith.constant 0 : index
    %0 = vector.load %arg5[%c0, %c0_0] : memref<16x16xbf16, #tpu.memory_space<vmem>>, vector<16x16xbf16>
    %cst = arith.constant 0.000000e+00 : f32
    %1 = vector.broadcast %cst : f32 to vector<16x64xf32>
    %cst_1 = arith.constant 0.000000e+00 : f32
    %2 = vector.broadcast %cst_1 : f32 to vector<16x64xf32>
    %c0_2 = arith.constant 0 : index
    %c0_3 = arith.constant 0 : index
    %3 = vector.load %arg1[%c0_2, %c0_3] : memref<16x8xf32, #tpu.memory_space<vmem>>, vector<16x1xf32>
    %c0_4 = arith.constant 0 : index
    %c0_5 = arith.constant 0 : index
    %4 = vector.load %arg2[%c0_4, %c0_5] : memref<8x16xf32, #tpu.memory_space<vmem>>, vector<1x16xf32>
    %5 = vector.broadcast %3 : vector<16x1xf32> to vector<16x16xf32>
    %6 = vector.broadcast %4 : vector<1x16xf32> to vector<16x16xf32>
    %7 = arith.addf %5, %6 : vector<16x16xf32>
    %cst_6 = arith.constant 2.000000e-01 : f32
    %8 = vector.broadcast %cst_6 : f32 to vector<16x16xf32>
    %9 = arith.mulf %8, %7 : vector<16x16xf32>
    %10 = arith.maximumf %7, %9 : vector<16x16xf32>
    %11 = arith.extf %0 : vector<16x16xbf16> to vector<16x16xf32>
    %12 = arith.addf %10, %11 : vector<16x16xf32>
    %cst_7 = arith.constant dense<0xFF800000> : vector<16xf32>
    %13 = vector.multi_reduction <maximumf>, %12, %cst_7 [1] : vector<16x16xf32> to vector<16xf32>
    %14 = vector.shape_cast %13 : vector<16xf32> to vector<16x1xf32>
    %15 = vector.broadcast %14 : vector<16x1xf32> to vector<16x16xf32>
    %16 = arith.subf %12, %15 : vector<16x16xf32>
    %17 = math.exp %16 : vector<16x16xf32>
    %cst_8 = arith.constant dense<0.000000e+00> : vector<16xf32>
    %18 = vector.multi_reduction <add>, %17, %cst_8 [1] : vector<16x16xf32> to vector<16xf32>
    %19 = vector.shape_cast %18 : vector<16xf32> to vector<16x1xf32>
    %20 = tpu.reciprocal %19 {approx = true} : vector<16x1xf32> -> vector<16x1xf32>
    %21 = arith.truncf %17 : vector<16x16xf32> to vector<16x16xbf16>
    %c0_9 = arith.constant 0 : index
    %c0_10 = arith.constant 0 : index
    %c0_11 = arith.constant 0 : index
    %22 = vector.load %arg3[%c0_9, %c0_10, %c0_11] : memref<8x16x64xbf16, #tpu.memory_space<vmem>>, vector<1x16x64xbf16>
    %23 = vector.shape_cast %22 : vector<1x16x64xbf16> to vector<16x64xbf16>
    %cst_12 = arith.constant dense<0.000000e+00> : vector<16x64xf32>
    %24 = tpu.matmul %21, %23, %cst_12 {dimension_numbers = #tpu.dot_dimension_numbers<[1], [0], [0], [1], [0, 0, 1, 1], [], []>} : vector<16x16xbf16>, vector<16x64xbf16>, vector<16x64xf32> -> vector<16x64xf32>
    %25 = arith.addf %1, %24 : vector<16x64xf32>
    %c0_13 = arith.constant 0 : index
    %c0_14 = arith.constant 0 : index
    %26 = vector.load %arg4[%c0_13, %c0_14] : memref<8x64xf32, #tpu.memory_space<vmem>>, vector<1x64xf32>
    %27 = vector.broadcast %20 : vector<16x1xf32> to vector<16x64xf32>
    %28 = vector.broadcast %26 : vector<1x64xf32> to vector<16x64xf32>
    %29 = arith.mulf %27, %28 : vector<16x64xf32>
    %30 = arith.addf %2, %29 : vector<16x64xf32>
    %c0_15 = arith.constant 0 : index
    %c1 = arith.constant 1 : index
    %31 = vector.load %arg1[%c0_15, %c1] : memref<16x8xf32, #tpu.memory_space<vmem>>, vector<16x1xf32>
    %c1_16 = arith.constant 1 : index
    %c0_17 = arith.constant 0 : index
    %32 = vector.load %arg2[%c1_16, %c0_17] : memref<8x16xf32, #tpu.memory_space<vmem>>, vector<1x16xf32>
    %33 = vector.broadcast %31 : vector<16x1xf32> to vector<16x16xf32>
    %34 = vector.broadcast %32 : vector<1x16xf32> to vector<16x16xf32>
    %35 = arith.addf %33, %34 : vector<16x16xf32>
    %cst_18 = arith.constant 2.000000e-01 : f32
    %36 = vector.broadcast %cst_18 : f32 to vector<16x16xf32>
    %37 = arith.mulf %36, %35 : vector<16x16xf32>
    %38 = arith.maximumf %35, %37 : vector<16x16xf32>
    %39 = arith.extf %0 : vector<16x16xbf16> to vector<16x16xf32>
    %40 = arith.addf %38, %39 : vector<16x16xf32>
    %cst_19 = arith.constant dense<0xFF800000> : vector<16xf32>
    %41 = vector.multi_reduction <maximumf>, %40, %cst_19 [1] : vector<16x16xf32> to vector<16xf32>
    %42 = vector.shape_cast %41 : vector<16xf32> to vector<16x1xf32>
    %43 = vector.broadcast %42 : vector<16x1xf32> to vector<16x16xf32>
    %44 = arith.subf %40, %43 : vector<16x16xf32>
    %45 = math.exp %44 : vector<16x16xf32>
    %cst_20 = arith.constant dense<0.000000e+00> : vector<16xf32>
    %46 = vector.multi_reduction <add>, %45, %cst_20 [1] : vector<16x16xf32> to vector<16xf32>
    %47 = vector.shape_cast %46 : vector<16xf32> to vector<16x1xf32>
    %48 = tpu.reciprocal %47 {approx = true} : vector<16x1xf32> -> vector<16x1xf32>
    %49 = arith.truncf %45 : vector<16x16xf32> to vector<16x16xbf16>
    %c1_21 = arith.constant 1 : index
    %c0_22 = arith.constant 0 : index
    %c0_23 = arith.constant 0 : index
    %50 = vector.load %arg3[%c1_21, %c0_22, %c0_23] : memref<8x16x64xbf16, #tpu.memory_space<vmem>>, vector<1x16x64xbf16>
    %51 = vector.shape_cast %50 : vector<1x16x64xbf16> to vector<16x64xbf16>
    %cst_24 = arith.constant dense<0.000000e+00> : vector<16x64xf32>
    %52 = tpu.matmul %49, %51, %cst_24 {dimension_numbers = #tpu.dot_dimension_numbers<[1], [0], [0], [1], [0, 0, 1, 1], [], []>} : vector<16x16xbf16>, vector<16x64xbf16>, vector<16x64xf32> -> vector<16x64xf32>
    %53 = arith.addf %25, %52 : vector<16x64xf32>
    %c1_25 = arith.constant 1 : index
    %c0_26 = arith.constant 0 : index
    %54 = vector.load %arg4[%c1_25, %c0_26] : memref<8x64xf32, #tpu.memory_space<vmem>>, vector<1x64xf32>
    %55 = vector.broadcast %48 : vector<16x1xf32> to vector<16x64xf32>
    %56 = vector.broadcast %54 : vector<1x64xf32> to vector<16x64xf32>
    %57 = arith.mulf %55, %56 : vector<16x64xf32>
    %58 = arith.addf %30, %57 : vector<16x64xf32>
    %c0_27 = arith.constant 0 : index
    %c2 = arith.constant 2 : index
    %59 = vector.load %arg1[%c0_27, %c2] : memref<16x8xf32, #tpu.memory_space<vmem>>, vector<16x1xf32>
    %c2_28 = arith.constant 2 : index
    %c0_29 = arith.constant 0 : index
    %60 = vector.load %arg2[%c2_28, %c0_29] : memref<8x16xf32, #tpu.memory_space<vmem>>, vector<1x16xf32>
    %61 = vector.broadcast %59 : vector<16x1xf32> to vector<16x16xf32>
    %62 = vector.broadcast %60 : vector<1x16xf32> to vector<16x16xf32>
    %63 = arith.addf %61, %62 : vector<16x16xf32>
    %cst_30 = arith.constant 2.000000e-01 : f32
    %64 = vector.broadcast %cst_30 : f32 to vector<16x16xf32>
    %65 = arith.mulf %64, %63 : vector<16x16xf32>
    %66 = arith.maximumf %63, %65 : vector<16x16xf32>
    %67 = arith.extf %0 : vector<16x16xbf16> to vector<16x16xf32>
    %68 = arith.addf %66, %67 : vector<16x16xf32>
    %cst_31 = arith.constant dense<0xFF800000> : vector<16xf32>
    %69 = vector.multi_reduction <maximumf>, %68, %cst_31 [1] : vector<16x16xf32> to vector<16xf32>
    %70 = vector.shape_cast %69 : vector<16xf32> to vector<16x1xf32>
    %71 = vector.broadcast %70 : vector<16x1xf32> to vector<16x16xf32>
    %72 = arith.subf %68, %71 : vector<16x16xf32>
    %73 = math.exp %72 : vector<16x16xf32>
    %cst_32 = arith.constant dense<0.000000e+00> : vector<16xf32>
    %74 = vector.multi_reduction <add>, %73, %cst_32 [1] : vector<16x16xf32> to vector<16xf32>
    %75 = vector.shape_cast %74 : vector<16xf32> to vector<16x1xf32>
    %76 = tpu.reciprocal %75 {approx = true} : vector<16x1xf32> -> vector<16x1xf32>
    %77 = arith.truncf %73 : vector<16x16xf32> to vector<16x16xbf16>
    %c2_33 = arith.constant 2 : index
    %c0_34 = arith.constant 0 : index
    %c0_35 = arith.constant 0 : index
    %78 = vector.load %arg3[%c2_33, %c0_34, %c0_35] : memref<8x16x64xbf16, #tpu.memory_space<vmem>>, vector<1x16x64xbf16>
    %79 = vector.shape_cast %78 : vector<1x16x64xbf16> to vector<16x64xbf16>
    %cst_36 = arith.constant dense<0.000000e+00> : vector<16x64xf32>
    %80 = tpu.matmul %77, %79, %cst_36 {dimension_numbers = #tpu.dot_dimension_numbers<[1], [0], [0], [1], [0, 0, 1, 1], [], []>} : vector<16x16xbf16>, vector<16x64xbf16>, vector<16x64xf32> -> vector<16x64xf32>
    %81 = arith.addf %53, %80 : vector<16x64xf32>
    %c2_37 = arith.constant 2 : index
    %c0_38 = arith.constant 0 : index
    %82 = vector.load %arg4[%c2_37, %c0_38] : memref<8x64xf32, #tpu.memory_space<vmem>>, vector<1x64xf32>
    %83 = vector.broadcast %76 : vector<16x1xf32> to vector<16x64xf32>
    %84 = vector.broadcast %82 : vector<1x64xf32> to vector<16x64xf32>
    %85 = arith.mulf %83, %84 : vector<16x64xf32>
    %86 = arith.addf %58, %85 : vector<16x64xf32>
    %c0_39 = arith.constant 0 : index
    %c3 = arith.constant 3 : index
    %87 = vector.load %arg1[%c0_39, %c3] : memref<16x8xf32, #tpu.memory_space<vmem>>, vector<16x1xf32>
    %c3_40 = arith.constant 3 : index
    %c0_41 = arith.constant 0 : index
    %88 = vector.load %arg2[%c3_40, %c0_41] : memref<8x16xf32, #tpu.memory_space<vmem>>, vector<1x16xf32>
    %89 = vector.broadcast %87 : vector<16x1xf32> to vector<16x16xf32>
    %90 = vector.broadcast %88 : vector<1x16xf32> to vector<16x16xf32>
    %91 = arith.addf %89, %90 : vector<16x16xf32>
    %cst_42 = arith.constant 2.000000e-01 : f32
    %92 = vector.broadcast %cst_42 : f32 to vector<16x16xf32>
    %93 = arith.mulf %92, %91 : vector<16x16xf32>
    %94 = arith.maximumf %91, %93 : vector<16x16xf32>
    %95 = arith.extf %0 : vector<16x16xbf16> to vector<16x16xf32>
    %96 = arith.addf %94, %95 : vector<16x16xf32>
    %cst_43 = arith.constant dense<0xFF800000> : vector<16xf32>
    %97 = vector.multi_reduction <maximumf>, %96, %cst_43 [1] : vector<16x16xf32> to vector<16xf32>
    %98 = vector.shape_cast %97 : vector<16xf32> to vector<16x1xf32>
    %99 = vector.broadcast %98 : vector<16x1xf32> to vector<16x16xf32>
    %100 = arith.subf %96, %99 : vector<16x16xf32>
    %101 = math.exp %100 : vector<16x16xf32>
    %cst_44 = arith.constant dense<0.000000e+00> : vector<16xf32>
    %102 = vector.multi_reduction <add>, %101, %cst_44 [1] : vector<16x16xf32> to vector<16xf32>
    %103 = vector.shape_cast %102 : vector<16xf32> to vector<16x1xf32>
    %104 = tpu.reciprocal %103 {approx = true} : vector<16x1xf32> -> vector<16x1xf32>
    %105 = arith.truncf %101 : vector<16x16xf32> to vector<16x16xbf16>
    %c3_45 = arith.constant 3 : index
    %c0_46 = arith.constant 0 : index
    %c0_47 = arith.constant 0 : index
    %106 = vector.load %arg3[%c3_45, %c0_46, %c0_47] : memref<8x16x64xbf16, #tpu.memory_space<vmem>>, vector<1x16x64xbf16>
    %107 = vector.shape_cast %106 : vector<1x16x64xbf16> to vector<16x64xbf16>
    %cst_48 = arith.constant dense<0.000000e+00> : vector<16x64xf32>
    %108 = tpu.matmul %105, %107, %cst_48 {dimension_numbers = #tpu.dot_dimension_numbers<[1], [0], [0], [1], [0, 0, 1, 1], [], []>} : vector<16x16xbf16>, vector<16x64xbf16>, vector<16x64xf32> -> vector<16x64xf32>
    %109 = arith.addf %81, %108 : vector<16x64xf32>
    %c3_49 = arith.constant 3 : index
    %c0_50 = arith.constant 0 : index
    %110 = vector.load %arg4[%c3_49, %c0_50] : memref<8x64xf32, #tpu.memory_space<vmem>>, vector<1x64xf32>
    %111 = vector.broadcast %104 : vector<16x1xf32> to vector<16x64xf32>
    %112 = vector.broadcast %110 : vector<1x64xf32> to vector<16x64xf32>
    %113 = arith.mulf %111, %112 : vector<16x64xf32>
    %114 = arith.addf %86, %113 : vector<16x64xf32>
    %c0_51 = arith.constant 0 : index
    %c4 = arith.constant 4 : index
    %115 = vector.load %arg1[%c0_51, %c4] : memref<16x8xf32, #tpu.memory_space<vmem>>, vector<16x1xf32>
    %c4_52 = arith.constant 4 : index
    %c0_53 = arith.constant 0 : index
    %116 = vector.load %arg2[%c4_52, %c0_53] : memref<8x16xf32, #tpu.memory_space<vmem>>, vector<1x16xf32>
    %117 = vector.broadcast %115 : vector<16x1xf32> to vector<16x16xf32>
    %118 = vector.broadcast %116 : vector<1x16xf32> to vector<16x16xf32>
    %119 = arith.addf %117, %118 : vector<16x16xf32>
    %cst_54 = arith.constant 2.000000e-01 : f32
    %120 = vector.broadcast %cst_54 : f32 to vector<16x16xf32>
    %121 = arith.mulf %120, %119 : vector<16x16xf32>
    %122 = arith.maximumf %119, %121 : vector<16x16xf32>
    %123 = arith.extf %0 : vector<16x16xbf16> to vector<16x16xf32>
    %124 = arith.addf %122, %123 : vector<16x16xf32>
    %cst_55 = arith.constant dense<0xFF800000> : vector<16xf32>
    %125 = vector.multi_reduction <maximumf>, %124, %cst_55 [1] : vector<16x16xf32> to vector<16xf32>
    %126 = vector.shape_cast %125 : vector<16xf32> to vector<16x1xf32>
    %127 = vector.broadcast %126 : vector<16x1xf32> to vector<16x16xf32>
    %128 = arith.subf %124, %127 : vector<16x16xf32>
    %129 = math.exp %128 : vector<16x16xf32>
    %cst_56 = arith.constant dense<0.000000e+00> : vector<16xf32>
    %130 = vector.multi_reduction <add>, %129, %cst_56 [1] : vector<16x16xf32> to vector<16xf32>
    %131 = vector.shape_cast %130 : vector<16xf32> to vector<16x1xf32>
    %132 = tpu.reciprocal %131 {approx = true} : vector<16x1xf32> -> vector<16x1xf32>
    %133 = arith.truncf %129 : vector<16x16xf32> to vector<16x16xbf16>
    %c4_57 = arith.constant 4 : index
    %c0_58 = arith.constant 0 : index
    %c0_59 = arith.constant 0 : index
    %134 = vector.load %arg3[%c4_57, %c0_58, %c0_59] : memref<8x16x64xbf16, #tpu.memory_space<vmem>>, vector<1x16x64xbf16>
    %135 = vector.shape_cast %134 : vector<1x16x64xbf16> to vector<16x64xbf16>
    %cst_60 = arith.constant dense<0.000000e+00> : vector<16x64xf32>
    %136 = tpu.matmul %133, %135, %cst_60 {dimension_numbers = #tpu.dot_dimension_numbers<[1], [0], [0], [1], [0, 0, 1, 1], [], []>} : vector<16x16xbf16>, vector<16x64xbf16>, vector<16x64xf32> -> vector<16x64xf32>
    %137 = arith.addf %109, %136 : vector<16x64xf32>
    %c4_61 = arith.constant 4 : index
    %c0_62 = arith.constant 0 : index
    %138 = vector.load %arg4[%c4_61, %c0_62] : memref<8x64xf32, #tpu.memory_space<vmem>>, vector<1x64xf32>
    %139 = vector.broadcast %132 : vector<16x1xf32> to vector<16x64xf32>
    %140 = vector.broadcast %138 : vector<1x64xf32> to vector<16x64xf32>
    %141 = arith.mulf %139, %140 : vector<16x64xf32>
    %142 = arith.addf %114, %141 : vector<16x64xf32>
    %c0_63 = arith.constant 0 : index
    %c5 = arith.constant 5 : index
    %143 = vector.load %arg1[%c0_63, %c5] : memref<16x8xf32, #tpu.memory_space<vmem>>, vector<16x1xf32>
    %c5_64 = arith.constant 5 : index
    %c0_65 = arith.constant 0 : index
    %144 = vector.load %arg2[%c5_64, %c0_65] : memref<8x16xf32, #tpu.memory_space<vmem>>, vector<1x16xf32>
    %145 = vector.broadcast %143 : vector<16x1xf32> to vector<16x16xf32>
    %146 = vector.broadcast %144 : vector<1x16xf32> to vector<16x16xf32>
    %147 = arith.addf %145, %146 : vector<16x16xf32>
    %cst_66 = arith.constant 2.000000e-01 : f32
    %148 = vector.broadcast %cst_66 : f32 to vector<16x16xf32>
    %149 = arith.mulf %148, %147 : vector<16x16xf32>
    %150 = arith.maximumf %147, %149 : vector<16x16xf32>
    %151 = arith.extf %0 : vector<16x16xbf16> to vector<16x16xf32>
    %152 = arith.addf %150, %151 : vector<16x16xf32>
    %cst_67 = arith.constant dense<0xFF800000> : vector<16xf32>
    %153 = vector.multi_reduction <maximumf>, %152, %cst_67 [1] : vector<16x16xf32> to vector<16xf32>
    %154 = vector.shape_cast %153 : vector<16xf32> to vector<16x1xf32>
    %155 = vector.broadcast %154 : vector<16x1xf32> to vector<16x16xf32>
    %156 = arith.subf %152, %155 : vector<16x16xf32>
    %157 = math.exp %156 : vector<16x16xf32>
    %cst_68 = arith.constant dense<0.000000e+00> : vector<16xf32>
    %158 = vector.multi_reduction <add>, %157, %cst_68 [1] : vector<16x16xf32> to vector<16xf32>
    %159 = vector.shape_cast %158 : vector<16xf32> to vector<16x1xf32>
    %160 = tpu.reciprocal %159 {approx = true} : vector<16x1xf32> -> vector<16x1xf32>
    %161 = arith.truncf %157 : vector<16x16xf32> to vector<16x16xbf16>
    %c5_69 = arith.constant 5 : index
    %c0_70 = arith.constant 0 : index
    %c0_71 = arith.constant 0 : index
    %162 = vector.load %arg3[%c5_69, %c0_70, %c0_71] : memref<8x16x64xbf16, #tpu.memory_space<vmem>>, vector<1x16x64xbf16>
    %163 = vector.shape_cast %162 : vector<1x16x64xbf16> to vector<16x64xbf16>
    %cst_72 = arith.constant dense<0.000000e+00> : vector<16x64xf32>
    %164 = tpu.matmul %161, %163, %cst_72 {dimension_numbers = #tpu.dot_dimension_numbers<[1], [0], [0], [1], [0, 0, 1, 1], [], []>} : vector<16x16xbf16>, vector<16x64xbf16>, vector<16x64xf32> -> vector<16x64xf32>
    %165 = arith.addf %137, %164 : vector<16x64xf32>
    %c5_73 = arith.constant 5 : index
    %c0_74 = arith.constant 0 : index
    %166 = vector.load %arg4[%c5_73, %c0_74] : memref<8x64xf32, #tpu.memory_space<vmem>>, vector<1x64xf32>
    %167 = vector.broadcast %160 : vector<16x1xf32> to vector<16x64xf32>
    %168 = vector.broadcast %166 : vector<1x64xf32> to vector<16x64xf32>
    %169 = arith.mulf %167, %168 : vector<16x64xf32>
    %170 = arith.addf %142, %169 : vector<16x64xf32>
    %c0_75 = arith.constant 0 : index
    %c6 = arith.constant 6 : index
    %171 = vector.load %arg1[%c0_75, %c6] : memref<16x8xf32, #tpu.memory_space<vmem>>, vector<16x1xf32>
    %c6_76 = arith.constant 6 : index
    %c0_77 = arith.constant 0 : index
    %172 = vector.load %arg2[%c6_76, %c0_77] : memref<8x16xf32, #tpu.memory_space<vmem>>, vector<1x16xf32>
    %173 = vector.broadcast %171 : vector<16x1xf32> to vector<16x16xf32>
    %174 = vector.broadcast %172 : vector<1x16xf32> to vector<16x16xf32>
    %175 = arith.addf %173, %174 : vector<16x16xf32>
    %cst_78 = arith.constant 2.000000e-01 : f32
    %176 = vector.broadcast %cst_78 : f32 to vector<16x16xf32>
    %177 = arith.mulf %176, %175 : vector<16x16xf32>
    %178 = arith.maximumf %175, %177 : vector<16x16xf32>
    %179 = arith.extf %0 : vector<16x16xbf16> to vector<16x16xf32>
    %180 = arith.addf %178, %179 : vector<16x16xf32>
    %cst_79 = arith.constant dense<0xFF800000> : vector<16xf32>
    %181 = vector.multi_reduction <maximumf>, %180, %cst_79 [1] : vector<16x16xf32> to vector<16xf32>
    %182 = vector.shape_cast %181 : vector<16xf32> to vector<16x1xf32>
    %183 = vector.broadcast %182 : vector<16x1xf32> to vector<16x16xf32>
    %184 = arith.subf %180, %183 : vector<16x16xf32>
    %185 = math.exp %184 : vector<16x16xf32>
    %cst_80 = arith.constant dense<0.000000e+00> : vector<16xf32>
    %186 = vector.multi_reduction <add>, %185, %cst_80 [1] : vector<16x16xf32> to vector<16xf32>
    %187 = vector.shape_cast %186 : vector<16xf32> to vector<16x1xf32>
    %188 = tpu.reciprocal %187 {approx = true} : vector<16x1xf32> -> vector<16x1xf32>
    %189 = arith.truncf %185 : vector<16x16xf32> to vector<16x16xbf16>
    %c6_81 = arith.constant 6 : index
    %c0_82 = arith.constant 0 : index
    %c0_83 = arith.constant 0 : index
    %190 = vector.load %arg3[%c6_81, %c0_82, %c0_83] : memref<8x16x64xbf16, #tpu.memory_space<vmem>>, vector<1x16x64xbf16>
    %191 = vector.shape_cast %190 : vector<1x16x64xbf16> to vector<16x64xbf16>
    %cst_84 = arith.constant dense<0.000000e+00> : vector<16x64xf32>
    %192 = tpu.matmul %189, %191, %cst_84 {dimension_numbers = #tpu.dot_dimension_numbers<[1], [0], [0], [1], [0, 0, 1, 1], [], []>} : vector<16x16xbf16>, vector<16x64xbf16>, vector<16x64xf32> -> vector<16x64xf32>
    %193 = arith.addf %165, %192 : vector<16x64xf32>
    %c6_85 = arith.constant 6 : index
    %c0_86 = arith.constant 0 : index
    %194 = vector.load %arg4[%c6_85, %c0_86] : memref<8x64xf32, #tpu.memory_space<vmem>>, vector<1x64xf32>
    %195 = vector.broadcast %188 : vector<16x1xf32> to vector<16x64xf32>
    %196 = vector.broadcast %194 : vector<1x64xf32> to vector<16x64xf32>
    %197 = arith.mulf %195, %196 : vector<16x64xf32>
    %198 = arith.addf %170, %197 : vector<16x64xf32>
    %c0_87 = arith.constant 0 : index
    %c7 = arith.constant 7 : index
    %199 = vector.load %arg1[%c0_87, %c7] : memref<16x8xf32, #tpu.memory_space<vmem>>, vector<16x1xf32>
    %c7_88 = arith.constant 7 : index
    %c0_89 = arith.constant 0 : index
    %200 = vector.load %arg2[%c7_88, %c0_89] : memref<8x16xf32, #tpu.memory_space<vmem>>, vector<1x16xf32>
    %201 = vector.broadcast %199 : vector<16x1xf32> to vector<16x16xf32>
    %202 = vector.broadcast %200 : vector<1x16xf32> to vector<16x16xf32>
    %203 = arith.addf %201, %202 : vector<16x16xf32>
    %cst_90 = arith.constant 2.000000e-01 : f32
    %204 = vector.broadcast %cst_90 : f32 to vector<16x16xf32>
    %205 = arith.mulf %204, %203 : vector<16x16xf32>
    %206 = arith.maximumf %203, %205 : vector<16x16xf32>
    %207 = arith.extf %0 : vector<16x16xbf16> to vector<16x16xf32>
    %208 = arith.addf %206, %207 : vector<16x16xf32>
    %cst_91 = arith.constant dense<0xFF800000> : vector<16xf32>
    %209 = vector.multi_reduction <maximumf>, %208, %cst_91 [1] : vector<16x16xf32> to vector<16xf32>
    %210 = vector.shape_cast %209 : vector<16xf32> to vector<16x1xf32>
    %211 = vector.broadcast %210 : vector<16x1xf32> to vector<16x16xf32>
    %212 = arith.subf %208, %211 : vector<16x16xf32>
    %213 = math.exp %212 : vector<16x16xf32>
    %cst_92 = arith.constant dense<0.000000e+00> : vector<16xf32>
    %214 = vector.multi_reduction <add>, %213, %cst_92 [1] : vector<16x16xf32> to vector<16xf32>
    %215 = vector.shape_cast %214 : vector<16xf32> to vector<16x1xf32>
    %216 = tpu.reciprocal %215 {approx = true} : vector<16x1xf32> -> vector<16x1xf32>
    %217 = arith.truncf %213 : vector<16x16xf32> to vector<16x16xbf16>
    %c7_93 = arith.constant 7 : index
    %c0_94 = arith.constant 0 : index
    %c0_95 = arith.constant 0 : index
    %218 = vector.load %arg3[%c7_93, %c0_94, %c0_95] : memref<8x16x64xbf16, #tpu.memory_space<vmem>>, vector<1x16x64xbf16>
    %219 = vector.shape_cast %218 : vector<1x16x64xbf16> to vector<16x64xbf16>
    %cst_96 = arith.constant dense<0.000000e+00> : vector<16x64xf32>
    %220 = tpu.matmul %217, %219, %cst_96 {dimension_numbers = #tpu.dot_dimension_numbers<[1], [0], [0], [1], [0, 0, 1, 1], [], []>} : vector<16x16xbf16>, vector<16x64xbf16>, vector<16x64xf32> -> vector<16x64xf32>
    %221 = arith.addf %193, %220 : vector<16x64xf32>
    %c7_97 = arith.constant 7 : index
    %c0_98 = arith.constant 0 : index
    %222 = vector.load %arg4[%c7_97, %c0_98] : memref<8x64xf32, #tpu.memory_space<vmem>>, vector<1x64xf32>
    %223 = vector.broadcast %216 : vector<16x1xf32> to vector<16x64xf32>
    %224 = vector.broadcast %222 : vector<1x64xf32> to vector<16x64xf32>
    %225 = arith.mulf %223, %224 : vector<16x64xf32>
    %226 = arith.addf %198, %225 : vector<16x64xf32>
    %227 = arith.mulf %221, %226 : vector<16x64xf32>
    %cst_99 = arith.constant 0.000000e+00 : f32
    %228 = vector.broadcast %cst_99 : f32 to vector<16x64xf32>
    %229 = arith.cmpf ogt, %227, %228 : vector<16x64xf32>
    %cst_100 = arith.constant 0.000000e+00 : f32
    %230 = vector.broadcast %cst_100 : f32 to vector<16x64xf32>
    %231 = arith.minimumf %227, %230 : vector<16x64xf32>
    %232 = math.exp %231 : vector<16x64xf32>
    %cst_101 = arith.constant 1.000000e+00 : f32
    %233 = vector.broadcast %cst_101 : f32 to vector<16x64xf32>
    %234 = arith.subf %232, %233 : vector<16x64xf32>
    %235 = arith.select %229, %227, %234 : vector<16x64xi1>, vector<16x64xf32>
    %c0_102 = arith.constant 0 : index
    %c0_103 = arith.constant 0 : index
    %236 = vector.load %arg6[%c0_102, %c0_103] : memref<16x64xf32, #tpu.memory_space<vmem>>, vector<16x64xf32>
    tpu.vector_store %arg6[%c0_102, %c0_103], %235 {strides = array<i32>} : memref<16x64xf32, #tpu.memory_space<vmem>>, vector<16x64xf32>,
    return
  }
  func.func @transform_0(%arg0: i32) -> (i32, i32) {
    %c0_i32 = arith.constant 0 : i32
    %c0_i32_0 = arith.constant 0 : i32
    return %arg0, %c0_i32 : i32, i32
  }
  func.func @transform_1(%arg0: i32) -> (i32, i32) {
    %c0_i32 = arith.constant 0 : i32
    %c0_i32_0 = arith.constant 0 : i32
    %c0_i32_1 = arith.constant 0 : i32
    return %c0_i32, %c0_i32_0 : i32, i32
  }
  func.func @transform_2(%arg0: i32) -> (i32, i32, i32) {
    %c0_i32 = arith.constant 0 : i32
    %c0_i32_0 = arith.constant 0 : i32
    %c0_i32_1 = arith.constant 0 : i32
    %c0_i32_2 = arith.constant 0 : i32
    return %c0_i32, %c0_i32_0, %c0_i32_1 : i32, i32, i32
  }
  func.func @transform_3(%arg0: i32) -> (i32, i32) {
    %c0_i32 = arith.constant 0 : i32
    %c0_i32_0 = arith.constant 0 : i32
    %c0_i32_1 = arith.constant 0 : i32
    return %c0_i32, %c0_i32_0 : i32, i32
  }
  func.func @transform_4(%arg0: i32) -> (i32, i32) {
    %c0_i32 = arith.constant 0 : i32
    %c0_i32_0 = arith.constant 0 : i32
    return %arg0, %c0_i32 : i32, i32
  }
  func.func @transform_5(%arg0: i32) -> (i32, i32) {
    %c0_i32 = arith.constant 0 : i32
    %c0_i32_0 = arith.constant 0 : i32
    return %arg0, %c0_i32 : i32, i32
  }
}

</mosaic_0001>

<bundles_post_ra>
// kernel: tpu_custom_call.1
= control target key start
LH: loop header
LB: loop body
LE: loop exit
PB: predicated region body
PF: predicated region fallthrough
CT: control target
= control target key end

     0   :  { %10 = vsyncpa [#allocation3], 0  ;;  %s1445_s0 = inlined_call_operand.vmem [shape: f32[16,8], index: 0, kind: input, shape index: {}]   ;;  %s1446_s1 = inlined_call_operand.vmem [shape: f32[8,16], index: 1, kind: input, shape index: {}]   ;;  %s1447_s2 = inlined_call_operand.hbm [shape: bf16[8,16,64], index: 2, kind: input, shape index: {}]   ;;  %s1448_s3 = inlined_call_operand.vmem [shape: f32[8,64], index: 3, kind: input, shape index: {}]   ;;  %s1449_s4 = inlined_call_operand.vmem [shape: bf16[16,16], index: 4, kind: input, shape index: {}]   ;;  %s1450_s5 = inlined_call_operand.hbm [shape: f32[16,64], index: 5, kind: output, shape index: {}]  }
   0x1   :  { %11 = vsyncpa [#allocation4], 0  ;;  %s1173_s18 = smov [#allocation2]  }
   0x2   :  { %s21_s19 = sshll.u32 %s1173_s18, 4  ;;  %s22_s19 = int_to_ptr.vmem [resolvable:$true] %s21_s19 }
   0x3   :  { %s1137_s20 = scalar_lea.vmem %s22_s19, 1024  ;;  %p1142_p1 = scmp.lt.s32.totalorder %s22_s19, %s22_s19 }
   0x4   :  { %p1138_p0 = scmp.ne.s32.totalorder %s22_s19, %s1137_s20  ;;  %p1143_p2 = scmp.lt.s32.totalorder %s1137_s20, %s1137_s20 }
   0x6   :  { %p1144_p3 = por %p1143_p2, %p1142_p1 }
   0x8   :  { %p1145_p4 = pnand %p1144_p3, %p1138_p0 }
   0xa   :  { %1148 = shalt.err (!%p1145_p4)
}
   0xb   :  { %s1174_s21 = smov 64   ;;  %s1175_s22 = smov 4  }
   0xc   :  { %27 = dma.hbm_to_vmem [thread:$0]  %s1447_s2, 1024, %s22_s19, [#allocation3], %s1174_s21, %s1174_s21, %s1175_s22  }
   0xd   :  { %1169 = dma.done.wait [#allocation3], 1024  }
   0xe   :  { %1170 = vsyncadd [#allocation3], 4294966272  ;;  %v1176_v0 = vmov 1   ;;  %v1177_v1 = vmov 0   ;;  %v38_v2 = vld [vmem:[%s1445_s0] sm:$0xff]  ;;  %v39_v3 = vld [vmem:[%s1445_s0 + $0x8] sm:$0xff] }
   0xf   :  { %1040 = vset.pattern.permute.xlu0 %v1176_v0  ;;  %1041 = vset.pattern.permute.xlu1 %v1177_v1  ;;  %v1178_v4 = vmov 2   ;;  %v1179_v5 = vmov 3   ;;  %v1180_v6 = vmov 4   ;;  %v1181_v7 = vmov 5   ;;  %v922_v10 = vld [vmem:[%s1446_s1] ss:$0 sm:$0xff] }
  0x10   :  { %43 = vperm.xlu1 %1041, %v38_v2   ;;  %100 = vperm.xlu0 %1040, %v38_v2   ;;  %v1182_v8 = vmov 6   ;;  %v1183_v9 = vmov 7   ;;  %v924_v11 = vld [vmem:[%s1446_s1 + $0x1] ss:$0 sm:$0xff]  ;;  %vm65_vm0 = vcmask 130048   ;;  %vm1185_vm1 = vmmov 0  }
  0x11   :  { %v957_v14 = vld [vmem:[%s1449_s4] sm:$0xff]   ;;  %vm902_vm2 = vcmask 523264  }
  0x12   :  { %v1237_v19 = vunpack.c.l.bf16 %v957_v14  ;;  %v930_v28 = vld [vmem:[%s1446_s1 + $0x2] ss:$0 sm:$0xff]  ;;  %v1245_v30 = vunpack.c.h.bf16 %v957_v14  ;;  %v934_v42 = vld [vmem:[%s1446_s1 + $0x3] ss:$0 sm:$0xff]  ;;  %v938_v52 = vld [vmem:[%s1446_s1 + $0x4] ss:$0 sm:$0xff] }
  0x13   :  { %v942_v54 = vld [vmem:[%s1446_s1 + $0x5] ss:$0 sm:$0xff] }
  0x14   :  { %48 = vperm.xlu1 %1041, %v39_v3   ;;  %104 = vperm.xlu0 %1040, %v39_v3  }
  0x18   :  { %1043 = vset.pattern.permute.xlu1 %v1178_v4  ;;  %1042 = vset.pattern.permute.xlu0 %v1178_v4 }
  0x19   :  { %258 = vperm.xlu1 %1043, %v39_v3   ;;  %254 = vperm.xlu0 %1042, %v38_v2  }
  0x1d   :  { %1044 = vset.pattern.permute.xlu1 %v1179_v5  ;;  %1045 = vset.pattern.permute.xlu0 %v1179_v5 }
  0x1e   :  { %360 = vperm.xlu1 %1044, %v38_v2   ;;  %364 = vperm.xlu0 %1045, %v39_v3  }
  0x22   :  { %1046 = vset.pattern.permute.xlu1 %v1180_v6  ;;  %1047 = vset.pattern.permute.xlu0 %v1181_v7 }
  0x23   :  { %466 = vperm.xlu1 %1046, %v38_v2   ;;  %572 = vperm.xlu0 %1047, %v38_v2  }
  0x27   :  { %470 = vperm.xlu1 %1046, %v39_v3   ;;  %1050 = vset.pattern.permute.xlu0 %v1182_v8 }
  0x28   :  { %682 = vperm.xlu0 %1050, %v39_v3  }
  0x2b   :  { %1048 = vset.pattern.permute.xlu1 %v1181_v7  ;;  %v946_v7 = vld [vmem:[%s1446_s1 + $0x6] ss:$0 sm:$0xff] }
  0x2c   :  { %576 = vperm.xlu1 %1048, %v39_v3   ;;  %1052 = vset.pattern.permute.xlu0 %v1183_v9 }
  0x30   :  { %1049 = vset.pattern.permute.xlu1 %v1182_v8 }
  0x31   :  { %678 = vperm.xlu1 %1049, %v38_v2  }
  0x35   :  { %1051 = vset.pattern.permute.xlu1 %v1183_v9 }
  0x36   :  { %784 = vperm.xlu1 %1051, %v38_v2  }
  0x3a   :  { %788 = vperm.xlu1 %1051, %v39_v3  }
  0x8b   :  { %v44_v12 = vpop.permute.xlu1 %43  ;;  %v101_v13 = vpop.permute.xlu0 %100 }
  0x8c   :  { %v55_v15 = vadd.f32 %v922_v10, %v44_v12  ;;  %v111_v16 = vadd.f32 %v924_v11, %v101_v13 }
  0x8e   :  { %v57_v17 = vmul.f32 0.2, %v55_v15  ;;  %v113_v18 = vmul.f32 0.2, %v111_v16 }
  0x8f   :  { %v49_v20 = vpop.permute.xlu1 %48  ;;  %v105_v21 = vpop.permute.xlu0 %104 }
  0x90   :  { %v59_v22 = vmax.f32 %v55_v15, %v57_v17  ;;  %v115_v23 = vmax.f32 %v111_v16, %v113_v18  ;;  %v56_v24 = vadd.f32 %v922_v10, %v49_v20  ;;  %v112_v25 = vadd.f32 %v924_v11, %v105_v21 }
  0x92   :  { %v58_v26 = vmul.f32 0.2, %v56_v24  ;;  %v114_v27 = vmul.f32 0.2, %v112_v25  ;;  %v1243_v29 = vadd.f32 %v1237_v19, %v115_v23  ;;  %v1250_v36 = vadd.f32 %v1237_v19, %v59_v22 }
  0x94   :  { %v60_v31 = vmax.f32 %v56_v24, %v58_v26  ;;  %v116_v32 = vmax.f32 %v112_v25, %v114_v27  ;;  %v259_v33 = vpop.permute.xlu1 %258  ;;  %v255_v34 = vpop.permute.xlu0 %254  ;;  %v119_v35 = vsel %vm65_vm0, %v1243_v29, -inf  ;;  %v66_v44 = vsel %vm65_vm0, %v1250_v36, -inf }
  0x95   :  { %v266_v37 = vadd.f32 %v930_v28, %v259_v33  ;;  %v265_v38 = vadd.f32 %v930_v28, %v255_v34  ;;  %120 = vmax.xlane.f32.xlu0 %v119_v35 }
  0x96   :  { %v1253_v39 = vadd.f32 %v1245_v30, %v116_v32  ;;  %v1263_v45 = vadd.f32 %v1245_v30, %v60_v31 }
  0x97   :  { %v268_v40 = vmul.f32 0.2, %v266_v37  ;;  %v267_v41 = vmul.f32 0.2, %v265_v38 }
  0x98   :  { %v122_v43 = vsel %vm65_vm0, %v1253_v39, -inf  ;;  %v69_v57 = vsel %vm65_vm0, %v1263_v45, -inf }
  0x99   :  { %v270_v46 = vmax.f32 %v266_v37, %v268_v40  ;;  %v269_v47 = vmax.f32 %v265_v38, %v267_v41  ;;  %v361_v48 = vpop.permute.xlu1 %360  ;;  %123 = vmax.xlane.f32.xlu1 %v122_v43  ;;  %67 = vmax.xlane.f32.xlu0 %v66_v44  ;;  %v365_v49 = vpop.permute.xlu0 %364  ;;  %v950_v40 = vld [vmem:[%s1446_s1 + $0x7] ss:$0 sm:$0xff] }
  0x9a   :  { %v371_v50 = vadd.f32 %v934_v42, %v361_v48  ;;  %v372_v51 = vadd.f32 %v934_v42, %v365_v49  ;;  %v1053_v48 = vld [vmem:[#allocation2 + $0x8] sm:$0xff]  }
  0x9b   :  { %v1269_v53 = vadd.f32 %v1237_v19, %v269_v47  ;;  %v1277_v58 = vadd.f32 %v1245_v30, %v270_v46 }
  0x9c   :  { %v373_v55 = vmul.f32 0.2, %v371_v50  ;;  %v374_v56 = vmul.f32 0.2, %v372_v51 }
  0x9d   :  { %70 = vmax.xlane.f32.xlu0 %v69_v57  ;;  %v273_v59 = vsel %vm65_vm0, %v1269_v53, -inf  ;;  %v276_v2 = vsel %vm65_vm0, %v1277_v58, -inf }
  0x9e   :  { %v375_v60 = vmax.f32 %v371_v50, %v373_v55  ;;  %v376_v61 = vmax.f32 %v372_v51, %v374_v56  ;;  %v467_v62 = vpop.permute.xlu1 %466  ;;  %274 = vmax.xlane.f32.xlu1 %v273_v59  ;;  %v573_v63 = vpop.permute.xlu0 %572  ;;  %v1184_v50 = vmov 0.0   ;;  %v1054_v56 = vld [vmem:[#allocation2] sm:$0xff]  }
  0x9f   :  { %v477_v0 = vadd.f32 %v938_v52, %v467_v62  ;;  %v583_v1 = vadd.f32 %v942_v54, %v573_v63  ;;  %976 = vmatprep.subr.bf16.mxu0 %v1184_v50  ;;  %982 = vmatprep.subr.bf16.mxu1 %v1184_v50 }
  0xa0   :  { %v1284_v3 = vadd.f32 %v1237_v19, %v375_v60  ;;  %v1287_v4 = vadd.f32 %v1245_v30, %v376_v61  ;;  %977 = vmatpush3.bf16.msra.mxu0 %v1053_v48  ;;  %978 = vmatprep.mubr.msk.bf16.mxu0 %vm1185_vm1, %v1184_v50 }
  0xa1   :  { %v479_v5 = vmul.f32 0.2, %v477_v0  ;;  %277 = vmax.xlane.f32.xlu0 %v276_v2  ;;  %v585_v6 = vmul.f32 0.2, %v583_v1  ;;  %988 = vmatprep.subr.bf16.mxu0 %v1184_v50 }
  0xa2   :  { %v471_v8 = vpop.permute.xlu1 %470  ;;  %v379_v9 = vsel %vm65_vm0, %v1284_v3, -inf  ;;  %v382_v10 = vsel %vm65_vm0, %v1287_v4, -inf  ;;  %984 = vmatprep.mubr.msk.bf16.mxu1 %vm1185_vm1, %v1184_v50  ;;  %983 = vmatpush3.bf16.msra.mxu1 %v1054_v56 }
  0xa3   :  { %v481_v11 = vmax.f32 %v477_v0, %v479_v5  ;;  %v478_v12 = vadd.f32 %v938_v52, %v471_v8  ;;  %v587_v13 = vmax.f32 %v583_v1, %v585_v6  ;;  %380 = vmax.xlane.f32.xlu1 %v379_v9  ;;  %v683_v14 = vpop.permute.xlu0 %682  ;;  %994 = vmatprep.subr.bf16.mxu1 %v1184_v50 }
  0xa4   :  { %v690_v15 = vadd.f32 %v946_v7, %v683_v14 }
  0xa5   :  { %v480_v16 = vmul.f32 0.2, %v478_v12  ;;  %383 = vmax.xlane.f32.xlu0 %v382_v10  ;;  %v1297_v17 = vadd.f32 %v1237_v19, %v481_v11  ;;  %v1300_v18 = vadd.f32 %v1237_v19, %v587_v13 }
  0xa6   :  { %v692_v20 = vmul.f32 0.2, %v690_v15 }
  0xa7   :  { %v482_v21 = vmax.f32 %v478_v12, %v480_v16  ;;  %v577_v22 = vpop.permute.xlu1 %576  ;;  %v485_v23 = vsel %vm65_vm0, %v1297_v17, -inf  ;;  %v591_v25 = vsel %vm65_vm0, %v1300_v18, -inf }
  0xa8   :  { %v584_v24 = vadd.f32 %v942_v54, %v577_v22  ;;  %486 = vmax.xlane.f32.xlu1 %v485_v23  ;;  %v694_v28 = vmax.f32 %v690_v15, %v692_v20 }
  0xa9   :  { %v1307_v26 = vadd.f32 %v1245_v30, %v482_v21 }
  0xaa   :  { %v586_v27 = vmul.f32 0.2, %v584_v24  ;;  %v1315_v37 = vadd.f32 %v1245_v30, %v694_v28 }
  0xab   :  { %v488_v31 = vsel %vm65_vm0, %v1307_v26, -inf }
  0xac   :  { %v588_v32 = vmax.f32 %v584_v24, %v586_v27  ;;  %v679_v33 = vpop.permute.xlu1 %678  ;;  %592 = vmax.xlane.f32.xlu1 %v591_v25  ;;  %489 = vmax.xlane.f32.xlu0 %v488_v31  ;;  %v700_v46 = vsel %vm65_vm0, %v1315_v37, -inf }
  0xad   :  { %v689_v34 = vadd.f32 %v946_v7, %v679_v33 }
  0xae   :  { %v1312_v35 = vadd.f32 %v1245_v30, %v588_v32 }
  0xaf   :  { %v691_v38 = vmul.f32 0.2, %v689_v34 }
  0xb0   :  { %v594_v41 = vsel %vm65_vm0, %v1312_v35, -inf }
  0xb1   :  { %v693_v42 = vmax.f32 %v689_v34, %v691_v38  ;;  %v785_v43 = vpop.permute.xlu1 %784  ;;  %595 = vmax.xlane.f32.xlu0 %v594_v41  ;;  %v1056_v41 = vld [vmem:[#allocation2 + $0x18] sm:$0xff]  }
  0xb2   :  { %v795_v44 = vadd.f32 %v950_v40, %v785_v43 }
  0xb3   :  { %v1325_v47 = vadd.f32 %v1237_v19, %v693_v42 }
  0xb4   :  { %v797_v49 = vmul.f32 0.2, %v795_v44 }
  0xb5   :  { %v789_v51 = vpop.permute.xlu1 %788  ;;  %701 = vmax.xlane.f32.xlu0 %v700_v46  ;;  %v697_v52 = vsel %vm65_vm0, %v1325_v47, -inf }
  0xb6   :  { %v799_v54 = vmax.f32 %v795_v44, %v797_v49  ;;  %v796_v55 = vadd.f32 %v950_v40, %v789_v51  ;;  %698 = vmax.xlane.f32.xlu1 %v697_v52  ;;  %v1057_v49 = vld [vmem:[#allocation2 + $0x20] sm:$0xff]  }
  0xb8   :  { %v798_v57 = vmul.f32 0.2, %v796_v55  ;;  %v1337_v59 = vadd.f32 %v1237_v19, %v799_v54 }
  0xba   :  { %v800_v60 = vmax.f32 %v796_v55, %v798_v57  ;;  %v803_v61 = vsel %vm65_vm0, %v1337_v59, -inf }
  0xbb   :  { %804 = vmax.xlane.f32.xlu1 %v803_v61 }
  0xbc   :  { %v1343_v62 = vadd.f32 %v1245_v30, %v800_v60 }
  0xbe   :  { %v806_v63 = vsel %vm65_vm0, %v1343_v62, -inf }
  0xbf   :  { %807 = vmax.xlane.f32.xlu0 %v806_v63 }
 0x11e   :  { %v121_v0 = vpop.xlane.xlu0 %120 }
 0x11f   :  { %v125_v1 = vsub.f32 %v1243_v29, %v121_v0  ;;  %v1058_v0 = vld [vmem:[#allocation2 + $0x28] sm:$0xff]  }
 0x121   :  { %v127_v19 = vmul.f32 1.442695, %v125_v1 }
 0x122   :  { %v124_v2 = vpop.xlane.xlu1 %123  ;;  %v68_v5 = vpop.xlane.xlu0 %67 }
 0x123   :  { %v126_v6 = vsub.f32 %v1253_v39, %v124_v2  ;;  %v72_v7 = vsub.f32 %v1250_v36, %v68_v5  ;;  %1061 = vpow2.f32 %v127_v19 }
 0x125   :  { %v129_v8 = vmul.f32 1.442695, %v126_v6  ;;  %v74_v9 = vmul.f32 1.442695, %v72_v7 }
 0x126   :  { %v71_v10 = vpop.xlane.xlu0 %70 }
 0x127   :  { %1063 = vpow2.f32 %v129_v8  ;;  %v73_v30 = vsub.f32 %v1263_v45, %v71_v10  ;;  %v275_v11 = vpop.xlane.xlu1 %274 }
 0x128   :  { %1065 = vpow2.f32 %v74_v9  ;;  %v279_v12 = vsub.f32 %v1269_v53, %v275_v11 }
 0x129   :  { %v76_v13 = vmul.f32 1.442695, %v73_v30 }
 0x12a   :  { %v281_v29 = vmul.f32 1.442695, %v279_v12  ;;  %v278_v14 = vpop.xlane.xlu0 %277 }
 0x12b   :  { %1067 = vpow2.f32 %v76_v13  ;;  %v280_v15 = vsub.f32 %v1277_v58, %v278_v14  ;;  %v1055_v58 = vld [vmem:[#allocation2 + $0x10] sm:$0xff]  }
 0x12c   :  { %v381_v39 = vpop.xlane.xlu1 %380  ;;  %1069 = vpow2.f32 %v281_v29  ;;  %v1059_v29 = vld [vmem:[#allocation2 + $0x30] sm:$0xff]  }
 0x12d   :  { %v283_v16 = vmul.f32 1.442695, %v280_v15  ;;  %v385_v36 = vsub.f32 %v1284_v3, %v381_v39 }
 0x12e   :  { %v384_v20 = vpop.xlane.xlu0 %383 }
 0x12f   :  { %1071 = vpow2.f32 %v283_v16  ;;  %v387_v21 = vmul.f32 1.442695, %v385_v36  ;;  %v386_v45 = vsub.f32 %v1287_v4, %v384_v20  ;;  %v1060_v36 = vld [vmem:[#allocation2 + $0x38] sm:$0xff]  }
 0x130   :  { %v1062_v24 = vpop.eup %1061 }
 0x131   :  { %v389_v22 = vmul.f32 1.442695, %v386_v45  ;;  %v487_v23 = vpop.xlane.xlu1 %486  ;;  %1073 = vpow2.f32 %v387_v21 }
 0x132   :  { %v491_v53 = vsub.f32 %v1297_v17, %v487_v23 }
 0x133   :  { %1075 = vpow2.f32 %v389_v22 }
 0x134   :  { %v1064_v25 = vpop.eup %1063  ;;  %v493_v27 = vmul.f32 1.442695, %v491_v53 }
 0x135   :  { %v1066_v28 = vpop.eup %1065  ;;  %v593_v31 = vpop.xlane.xlu1 %592  ;;  %v139_v3 = vpack.c.bf16 %v1064_v25, %v1062_v24  ;;  %v134_v52 = vsel %vm65_vm0, %v1064_v25, 0.0 }
 0x136   :  { %v490_v32 = vpop.xlane.xlu0 %489  ;;  %1077 = vpow2.f32 %v493_v27  ;;  %v597_v33 = vsub.f32 %v1300_v18, %v593_v31  ;;  %v78_v4 = vsel %vm65_vm0, %v1066_v28, 0.0  ;;  %v131_v18 = vsel %vm65_vm0, %v1062_v24, 0.0 }
 0x137   :  { %v492_v34 = vsub.f32 %v1307_v26, %v490_v32  ;;  %79 = vadd.xlane.f32.xlu1 %v78_v4  ;;  %979 = vmatmul.mubr.msk.bf16.vlgmr.msra.gmra.mxu0 %vm65_vm0, %v139_v3 }
 0x138   :  { %v1068_v17 = vpop.eup %1067  ;;  %v599_v38 = vmul.f32 1.442695, %v597_v33  ;;  %989 = vmatpush3.bf16.msra.mxu0 %v1055_v58  ;;  %990 = vmatprep.mubr.msk.bf16.mxu0 %vm1185_vm1, %v1184_v50 }
 0x139   :  { %v495_v40 = vmul.f32 1.442695, %v492_v34  ;;  %v81_v42 = vsel %vm65_vm0, %v1068_v17, 0.0  ;;  %v86_v43 = vpack.c.bf16 %v1068_v17, %v1066_v28  ;;  %1000 = vmatprep.subr.bf16.mxu0 %v1184_v50  ;;  %v1070_v44 = vpop.eup %1069 }
 0x13a   :  { %1079 = vpow2.f32 %v599_v38  ;;  %82 = vadd.xlane.f32.xlu0 %v81_v42  ;;  %v596_v26 = vpop.xlane.xlu0 %595  ;;  %v285_v55 = vsel %vm65_vm0, %v1070_v44, 0.0 }
 0x13b   :  { %1081 = vpow2.f32 %v495_v40  ;;  %132 = vadd.xlane.f32.xlu1 %v131_v18  ;;  %v598_v46 = vsub.f32 %v1312_v35, %v596_v26  ;;  %985 = vmatmul.mubr.msk.bf16.vlgmr.msra.gmra.mxu1 %vm65_vm0, %v86_v43 }
 0x13c   :  { %v1072_v48 = vpop.eup %1071  ;;  %995 = vmatpush3.bf16.msra.mxu1 %v1056_v41  ;;  %996 = vmatprep.mubr.msk.bf16.mxu1 %vm1185_vm1, %v1184_v50 }
 0x13d   :  { %v601_v51 = vmul.f32 1.442695, %v598_v46  ;;  %v293_v54 = vpack.c.bf16 %v1072_v48, %v1070_v44  ;;  %1006 = vmatprep.subr.bf16.mxu1 %v1184_v50  ;;  %v288_v19 = vsel %vm65_vm0, %v1072_v48, 0.0 }
 0x13e   :  { %135 = vadd.xlane.f32.xlu0 %v134_v52  ;;  %v702_v56 = vpop.xlane.xlu0 %701  ;;  %v1074_v57 = vpop.eup %1073 }
 0x13f   :  { %1083 = vpow2.f32 %v601_v51  ;;  %286 = vadd.xlane.f32.xlu1 %v285_v55  ;;  %v704_v35 = vsub.f32 %v1315_v37, %v702_v56  ;;  %v699_v60 = vpop.xlane.xlu1 %698  ;;  %991 = vmatmul.mubr.msk.bf16.vlgmr.msra.gmra.mxu0 %vm65_vm0, %v293_v54  ;;  %v391_v37 = vsel %vm65_vm0, %v1074_v57, 0.0 }
 0x140   :  { %v1076_v61 = vpop.eup %1075  ;;  %v703_v63 = vsub.f32 %v1325_v47, %v699_v60  ;;  %1001 = vmatpush3.bf16.msra.mxu0 %v1057_v49  ;;  %1002 = vmatprep.mubr.msk.bf16.mxu0 %vm1185_vm1, %v1184_v50 }
 0x141   :  { %v707_v1 = vmul.f32 1.442695, %v704_v35  ;;  %v399_v2 = vpack.c.bf16 %v1076_v61, %v1074_v57  ;;  %1012 = vmatprep.subr.bf16.mxu0 %v1184_v50  ;;  %v394_v9 = vsel %vm65_vm0, %v1076_v61, 0.0 }
 0x142   :  { %v705_v5 = vmul.f32 1.442695, %v703_v63  ;;  %289 = vadd.xlane.f32.xlu0 %v288_v19 }
 0x143   :  { %v1078_v6 = vpop.eup %1077  ;;  %1085 = vpow2.f32 %v707_v1  ;;  %392 = vadd.xlane.f32.xlu1 %v391_v37  ;;  %997 = vmatmul.mubr.msk.bf16.vlgmr.msra.gmra.mxu1 %vm65_vm0, %v399_v2 }
 0x144   :  { %1087 = vpow2.f32 %v705_v5  ;;  %v805_v47 = vpop.xlane.xlu1 %804  ;;  %v497_v7 = vsel %vm65_vm0, %v1078_v6, 0.0  ;;  %1007 = vmatpush3.bf16.msra.mxu1 %v1058_v0  ;;  %1008 = vmatprep.mubr.msk.bf16.mxu1 %vm1185_vm1, %v1184_v50  ;;  %v929_v5 = vld [vmem:[%s1448_s3 + $0x1] ss:$0 sm:$0xff] }
 0x145   :  { %v809_v8 = vsub.f32 %v1337_v59, %v805_v47  ;;  %1018 = vmatprep.subr.bf16.mxu1 %v1184_v50 }
 0x146   :  { %395 = vadd.xlane.f32.xlu0 %v394_v9  ;;  %v933_v9 = vld [vmem:[%s1448_s3 + $0x2] ss:$0 sm:$0xff] }
 0x147   :  { %v1080_v10 = vpop.eup %1079  ;;  %v811_v30 = vmul.f32 1.442695, %v809_v8  ;;  %498 = vadd.xlane.f32.xlu1 %v497_v7  ;;  %v923_v8 = vld [vmem:[%s1448_s3] ss:$0 sm:$0xff] }
 0x148   :  { %v1082_v11 = vpop.eup %1081  ;;  %v808_v12 = vpop.xlane.xlu0 %807  ;;  %v603_v13 = vsel %vm65_vm0, %v1080_v10, 0.0 }
 0x149   :  { %1089 = vpow2.f32 %v811_v30  ;;  %v810_v14 = vsub.f32 %v1343_v62, %v808_v12  ;;  %v505_v15 = vpack.c.bf16 %v1082_v11, %v1078_v6  ;;  %v500_v39 = vsel %vm65_vm0, %v1082_v11, 0.0 }
 0x14a   :  { %501 = vadd.xlane.f32.xlu0 %v500_v39 }
 0x14b   :  { %v813_v59 = vmul.f32 1.442695, %v810_v14  ;;  %604 = vadd.xlane.f32.xlu1 %v603_v13  ;;  %1003 = vmatmul.mubr.msk.bf16.vlgmr.msra.gmra.mxu0 %vm65_vm0, %v505_v15  ;;  %v937_v14 = vld [vmem:[%s1448_s3 + $0x3] ss:$0 sm:$0xff] }
 0x14c   :  { %v1084_v16 = vpop.eup %1083  ;;  %1013 = vmatpush3.bf16.msra.mxu0 %v1059_v29  ;;  %1014 = vmatprep.mubr.msk.bf16.mxu0 %vm1185_vm1, %v1184_v50 }
 0x14d   :  { %1091 = vpow2.f32 %v813_v59  ;;  %v606_v20 = vsel %vm65_vm0, %v1084_v16, 0.0  ;;  %v611_v21 = vpack.c.bf16 %v1084_v16, %v1080_v10 }
 0x14e   :  { %607 = vadd.xlane.f32.xlu0 %v606_v20 }
 0x14f   :  { %1009 = vmatmul.mubr.msk.bf16.vlgmr.msra.gmra.mxu1 %vm65_vm0, %v611_v21 }
 0x150   :  { %v1086_v62 = vpop.eup %1085  ;;  %1019 = vmatpush3.bf16.msra.mxu1 %v1060_v36  ;;  %1020 = vmatprep.mubr.msk.bf16.mxu1 %vm1185_vm1, %v1184_v50 }
 0x151   :  { %v1088_v45 = vpop.eup %1087  ;;  %v712_v22 = vsel %vm65_vm0, %v1086_v62, 0.0 }
 0x152   :  { %713 = vadd.xlane.f32.xlu0 %v712_v22  ;;  %v709_v23 = vsel %vm65_vm0, %v1088_v45, 0.0  ;;  %v717_v53 = vpack.c.bf16 %v1086_v62, %v1088_v45  ;;  %v941_v62 = vld [vmem:[%s1448_s3 + $0x4] ss:$0 sm:$0xff] }
 0x153   :  { %710 = vadd.xlane.f32.xlu1 %v709_v23 }
 0x154   :  { %1015 = vmatmul.mubr.msk.bf16.vlgmr.msra.gmra.mxu0 %vm65_vm0, %v717_v53 }
 0x156   :  { %v1090_v24 = vpop.eup %1089 }
 0x157   :  { %v815_v25 = vsel %vm65_vm0, %v1090_v24, 0.0 }
 0x158   :  { %816 = vadd.xlane.f32.xlu1 %v815_v25 }
 0x15a   :  { %v1092_v27 = vpop.eup %1091 }
 0x15b   :  { %v818_v58 = vsel %vm65_vm0, %v1092_v27, 0.0  ;;  %v823_v28 = vpack.c.bf16 %v1092_v27, %v1090_v24 }
 0x15c   :  { %819 = vadd.xlane.f32.xlu0 %v818_v58 }
 0x15d   :  { %1021 = vmatmul.mubr.msk.bf16.vlgmr.msra.gmra.mxu1 %vm65_vm0, %v823_v28  ;;  %v945_v28 = vld [vmem:[%s1448_s3 + $0x5] ss:$0 sm:$0xff] }
 0x1c0   :  { %v80_v50 = vpop.xlane.xlu1 %79 }
 0x1c1   :  { %1093 = vrcp.f32 %v80_v50 }
 0x1c3   :  { %v83_v31 = vpop.xlane.xlu0 %82 }
 0x1c4   :  { %v133_v32 = vpop.xlane.xlu1 %132 }
 0x1c5   :  { %1095 = vrcp.f32 %v133_v32 }
 0x1c6   :  { %1097 = vrcp.f32 %v83_v31 }
 0x1c7   :  { %v136_v3 = vpop.xlane.xlu0 %135 }
 0x1c8   :  { %v287_v33 = vpop.xlane.xlu1 %286 }
 0x1c9   :  { %1099 = vrcp.f32 %v287_v33 }
 0x1ca   :  { %1101 = vrcp.f32 %v136_v3 }
 0x1cb   :  { %v290_v34 = vpop.xlane.xlu0 %289 }
 0x1cc   :  { %v393_v4 = vpop.xlane.xlu1 %392 }
 0x1cd   :  { %1103 = vrcp.f32 %v393_v4 }
 0x1ce   :  { %1105 = vrcp.f32 %v290_v34  ;;  %v1094_v19 = vpop.eup %1093 }
 0x1cf   :  { %v396_v17 = vpop.xlane.xlu0 %395  ;;  %v94_v39 = vmul.f32 %v1094_v19, %v923_v8 }
 0x1d0   :  { %v499_v38 = vpop.xlane.xlu1 %498 }
 0x1d1   :  { %1107 = vrcp.f32 %v499_v38 }
 0x1d2   :  { %1109 = vrcp.f32 %v396_v17  ;;  %v1096_v2 = vpop.eup %1095  ;;  %v949_v17 = vld [vmem:[%s1448_s3 + $0x6] ss:$0 sm:$0xff] }
 0x1d3   :  { %v502_v42 = vpop.xlane.xlu0 %501  ;;  %v1098_v47 = vpop.eup %1097  ;;  %v248_v11 = vmul.f32 %v1096_v2, %v929_v5 }
 0x1d4   :  { %v605_v26 = vpop.xlane.xlu1 %604  ;;  %v95_v25 = vmul.f32 %v1098_v47, %v923_v8 }
 0x1d5   :  { %1111 = vrcp.f32 %v605_v26  ;;  %v250_v23 = vadd.f32 %v248_v11, %v94_v39 }
 0x1d6   :  { %1113 = vrcp.f32 %v502_v42  ;;  %v1100_v7 = vpop.eup %1099 }
 0x1d7   :  { %v608_v51 = vpop.xlane.xlu0 %607  ;;  %v1102_v30 = vpop.eup %1101  ;;  %v354_v59 = vmul.f32 %v1100_v7, %v933_v9 }
 0x1d8   :  { %v249_v36 = vmul.f32 %v1102_v30, %v929_v5 }
 0x1d9   :  { %v356_v3 = vadd.f32 %v354_v59, %v250_v23 }
 0x1da   :  { %v1104_v12 = vpop.eup %1103  ;;  %v251_v38 = vadd.f32 %v249_v36, %v95_v25 }
 0x1db   :  { %v714_v61 = vpop.xlane.xlu0 %713  ;;  %v1106_v15 = vpop.eup %1105  ;;  %v460_v53 = vmul.f32 %v1104_v12, %v937_v14 }
 0x1dc   :  { %v711_v52 = vpop.xlane.xlu1 %710  ;;  %v355_v27 = vmul.f32 %v1106_v15, %v933_v9 }
 0x1dd   :  { %1115 = vrcp.f32 %v711_v52 }
 0x1de   :  { %1117 = vrcp.f32 %v608_v51  ;;  %v1108_v16 = vpop.eup %1107  ;;  %v953_v51 = vld [vmem:[%s1448_s3 + $0x7] ss:$0 sm:$0xff]  ;;  %v357_v52 = vadd.f32 %v355_v27, %v251_v38  ;;  %s1186_s3 = smov [#allocation5]  }
 0x1df   :  { %v1110_v45 = vpop.eup %1109  ;;  %v566_v33 = vmul.f32 %v1108_v16, %v941_v62  ;;  %s910_s7 = sshll.u32 %s1186_s3, 4  ;;  %s911_s7 = int_to_ptr.vmem [resolvable:$true] %s910_s7 }
 0x1e0   :  { %s1149_s8 = scalar_lea.vmem %s911_s7, 256  ;;  %p1154_p6 = scmp.lt.s32.totalorder %s911_s7, %s911_s7 }
 0x1e1   :  { %v817_v63 = vpop.xlane.xlu1 %816  ;;  %p1150_p5 = scmp.ne.s32.totalorder %s911_s7, %s1149_s8  ;;  %p1155_p7 = scmp.lt.s32.totalorder %s1149_s8, %s1149_s8 }
 0x1e2   :  { %1119 = vrcp.f32 %v817_v63  ;;  %v1112_v24 = vpop.eup %1111 }
 0x1e3   :  { %1121 = vrcp.f32 %v714_v61  ;;  %v1114_v50 = vpop.eup %1113  ;;  %p1156_p8 = por %p1155_p7, %p1154_p6 }
 0x1e5   :  { %v820_v37 = vpop.xlane.xlu0 %819  ;;  %p1157_p9 = pnand %p1156_p8, %p1150_p5 }
 0x1e6   :  { %1123 = vrcp.f32 %v820_v37 }
 0x1ea   :  { %v1116_v34 = vpop.eup %1115 }
 0x1eb   :  { %v778_v63 = vmul.f32 %v1116_v34, %v949_v17 }
 0x1f7   :  { %v1403_v40 = vpop.f32.mrf.mxu0 }
 0x1f9   :  { %v980_v41 = vpop.f32.mrf.mxu0 }
 0x1fa   :  { %v1118_v41 = vpop.eup %1117 }
 0x1fb   :  { %v1405_v43 = vpop.f32.mrf.mxu0  ;;  %v236_v18 = vpop.f32.mrf.mxu1 }
 0x1fc   :  { %v237_v22 = vadd.f32 %v236_v18, %v1403_v40  ;;  %v461_v40 = vmul.f32 %v1110_v45, %v937_v14 }
 0x1fd   :  { %v981_v44 = vpop.f32.mrf.mxu0  ;;  %v986_v46 = vpop.f32.mrf.mxu1 }
 0x1fe   :  { %v462_v44 = vadd.f32 %v460_v53, %v356_v3  ;;  %v672_v46 = vmul.f32 %v1112_v24, %v945_v28  ;;  %v463_v19 = vadd.f32 %v461_v40, %v357_v52 }
 0x1ff   :  { %v1407_v48 = vpop.f32.mrf.mxu1  ;;  %v340_v49 = vpop.f32.mrf.mxu0 }
 0x200   :  { %v347_v31 = vadd.f32 %v340_v49, %v237_v22  ;;  %v240_v42 = vadd.f32 %v1407_v48, %v1405_v43  ;;  %v1120_v49 = vpop.eup %1119  ;;  %v568_v61 = vadd.f32 %v566_v33, %v462_v44  ;;  %v673_v43 = vmul.f32 %v1118_v41, %v945_v28 }
 0x201   :  { %v987_v54 = vpop.f32.mrf.mxu1  ;;  %v992_v55 = vpop.f32.mrf.mxu0  ;;  %v884_v37 = vmul.f32 %v1120_v49, %v953_v51 }
 0x202   :  { %v567_v54 = vmul.f32 %v1114_v50, %v941_v62  ;;  %v674_v5 = vadd.f32 %v672_v46, %v568_v61 }
 0x203   :  { %v1409_v56 = vpop.f32.mrf.mxu0  ;;  %v446_v57 = vpop.f32.mrf.mxu1 }
 0x204   :  { %v453_v18 = vadd.f32 %v446_v57, %v347_v31  ;;  %v348_v55 = vadd.f32 %v1409_v56, %v240_v42  ;;  %v569_v7 = vadd.f32 %v567_v54, %v463_v19 }
 0x205   :  { %v993_v35 = vpop.f32.mrf.mxu0  ;;  %v998_v60 = vpop.f32.mrf.mxu1 }
 0x207   :  { %v1411_v0 = vpop.f32.mrf.mxu1 }
 0x208   :  { %v454_v48 = vadd.f32 %v1411_v0, %v348_v55 }
 0x209   :  { %v999_v1 = vpop.f32.mrf.mxu1 }
 0x20a   :  { %v1122_v1 = vpop.eup %1121 }
 0x20b   :  { %v552_v6 = vpop.f32.mrf.mxu0  ;;  %v1124_v47 = vpop.eup %1123  ;;  %v779_v30 = vmul.f32 %v1122_v1, %v949_v17 }
 0x20c   :  { %v559_v35 = vadd.f32 %v552_v6, %v453_v18  ;;  %v675_v6 = vadd.f32 %v673_v43, %v569_v7  ;;  %v885_v15 = vmul.f32 %v1124_v47, %v953_v51 }
 0x20d   :  { %v1004_v10 = vpop.f32.mrf.mxu0 }
 0x20e   :  { %v780_v10 = vadd.f32 %v778_v63, %v674_v5  ;;  %v781_v0 = vadd.f32 %v779_v30, %v675_v6 }
 0x20f   :  { %v555_v13 = vpop.f32.mrf.mxu0  ;;  %v658_v29 = vpop.f32.mrf.mxu1 }
 0x210   :  { %v665_v57 = vadd.f32 %v658_v29, %v559_v35  ;;  %v560_v8 = vadd.f32 %v555_v13, %v454_v48  ;;  %v886_v14 = vadd.f32 %v884_v37, %v780_v10 }
 0x211   :  { %v1005_v20 = vpop.f32.mrf.mxu0  ;;  %v1010_v21 = vpop.f32.mrf.mxu1 }
 0x212   :  { %v887_v21 = vadd.f32 %v885_v15, %v781_v0 }
 0x213   :  { %v661_v58 = vpop.f32.mrf.mxu1 }
 0x214   :  { %v764_v32 = vpop.f32.mrf.mxu0  ;;  %v666_v11 = vadd.f32 %v661_v58, %v560_v8 }
 0x215   :  { %v1011_v4 = vpop.f32.mrf.mxu1  ;;  %v771_v9 = vadd.f32 %v764_v32, %v665_v57 }
 0x216   :  { %v1016_v26 = vpop.f32.mrf.mxu0 }
 0x218   :  { %v767_v60 = vpop.f32.mrf.mxu0 }
 0x219   :  { %v772_v59 = vadd.f32 %v767_v60, %v666_v11 }
 0x21a   :  { %v1017_v2 = vpop.f32.mrf.mxu0 }
 0x21d   :  { %v870_v56 = vpop.f32.mrf.mxu1 }
 0x21e   :  { %v877_v12 = vadd.f32 %v870_v56, %v771_v9 }
 0x21f   :  { %v1022_v39 = vpop.f32.mrf.mxu1 }
 0x220   :  { %v888_v16 = vmul.f32 %v886_v14, %v877_v12 }
 0x221   :  { %v873_v29 = vpop.f32.mrf.mxu1 }
 0x222   :  { %v892_v36 = vmin.f32 %v888_v16, 0.0  ;;  %v878_v20 = vadd.f32 %v873_v29, %v772_v59  ;;  %vm890_vm3 = vcmp.gt.f32.partialorder %v888_v16, 0.0 }
 0x223   :  { %v1023_v62 = vpop.f32.mrf.mxu1 }
 0x224   :  { %v894_v45 = vmul.f32 1.442695, %v892_v36  ;;  %v889_v13 = vmul.f32 %v887_v21, %v878_v20 }
 0x226   :  { %1125 = vpow2.f32 %v894_v45  ;;  %v893_v22 = vmin.f32 %v889_v13, 0.0  ;;  %vm891_vm4 = vcmp.gt.f32.partialorder %v889_v13, 0.0 }
 0x228   :  { %v896_v23 = vmul.f32 1.442695, %v893_v22 }
 0x22a   :  { %1127 = vpow2.f32 %v896_v23 }
 0x233   :  { %v1126_v53 = vpop.eup %1125 }
 0x234   :  { %v954_v24 = vadd.f32 -1.0, %v1126_v53 }
 0x236   :  { %v900_v25 = vsel %vm890_vm3, %v888_v16, %v954_v24 }
 0x237   :  { %v1128_v27 = vpop.eup %1127  ;;  %903 = vst.msk [vmem:[#allocation5] sm:$0xff] %vm902_vm2, %v900_v25 }
 0x238   :  { %v955_v58 = vadd.f32 -1.0, %v1128_v27 }
 0x23a   :  { %v901_v28 = vsel %vm891_vm4, %v889_v13, %v955_v58 }
 0x23b   :  { %904 = vst.msk [vmem:[#allocation5 + $0x8] sm:$0xff] %vm902_vm2, %v901_v28 }
 0x23c   :  { %1160 = shalt.err (!%p1157_p9)
}
 0x23d   :  { %s1187_s9 = smov 128   ;;  %s1188_s4 = smov 8  }
 0x23e   :  { %916 = dma.vmem_to_hbm [thread:$0]  %s911_s7, 256, %s1450_s5, [#allocation4], %s1187_s9, %s1187_s9, %s1188_s4  }
 0x23f   :  { %1171 = dma.done.wait [#allocation4], 256  }
 0x240   :  { %1172 = vsyncadd [#allocation4], 4294967040 }
 0x241   :  { %920 = vsyncpa [#allocation3], 1 }
 0x242   :  { %921 = vsyncpa [#allocation4], 1 }

</bundles_post_ra>
